<compile_context>
chip_gen: v6e
topology: v6e:2x2x1
jax: 0.10.0
libtpu: 0.0.40
codegen_flags: <defaults>
</compile_context>

<pallas_src>
import functools

import jax
import jax.numpy as jnp
from jax.experimental import pallas as pl
from jax.experimental.pallas import tpu as pltpu


def _round_up(x, m):
    return (x + m - 1) // m * m


def _tpu_budget_and_cores():
    """Best-effort query of per-core VMEM capacity and TensorCore count."""
    cap = 64 * 1024 * 1024   # conservative default (v7x per-core VMEM)
    cores = 1
    try:
        info = pltpu.get_tpu_info()
        cap = int(getattr(info, "vmem_capacity_bytes", cap) or cap)
        for name in ("num_tensorcores", "num_cores", "tensorcore_count",
                     "core_count"):
            v = getattr(info, name, None)
            if v:
                try:
                    v = int(v)
                except Exception:
                    continue
                if v > 0:
                    cores = v
                    break
    except Exception:
        pass
    return max(cap, 32 * 1024 * 1024), cores


def _elman_recurrence_kernel(xw_ref, h0_ref, w_hh_t_ref, out_ref, h_scratch,
                             *, t_chunk):
    """One grid step = one (batch tile, time chunk) of the recurrence.

    Everything is time-major so per-step accesses are dense full-tile slabs.

    xw_ref:     (T_CHUNK, B_TILE, H_pad)  precomputed x @ W_ih^T + b
    h0_ref:     (B_TILE, H_pad)           initial hidden state (f32)
    w_hh_t_ref: (H_pad, H_pad)            W_hh^T (MXU dtype)
    out_ref:    (T_CHUNK, B_TILE, H_pad)  hidden states for this chunk
    h_scratch:  (B_TILE, H_pad)           f32 recurrent carry across time chunks
    """
    c = pl.program_id(1)

    @pl.when(c == 0)
    def _():
        h_scratch[...] = h0_ref[...].astype(jnp.float32)

    # Hoisted once per chunk; the value stays VMEM-resident for the MXU.
    w_hh_t = w_hh_t_ref[...]
    mxu_dtype = w_hh_t.dtype

    # Perf note: W_hh^T could additionally be staged in the MXU weight
    # registers once per chunk (pltpu.matmul_push_rhs + matmul_acc_lhs /
    # matmul_pop) so each step only streams the small LHS; left to the
    # compiler here for robustness across shapes / generations.
    h = h_scratch[...]                               # (B_TILE, H_pad) f32 carry
    for t in range(t_chunk):                         # fully unrolled, static
        hw = jnp.dot(h.astype(mxu_dtype), w_hh_t,
                     preferred_element_type=jnp.float32)
        # Per-step slab load from the VMEM block ref (keeps vreg pressure flat).
        h = jnp.tanh(xw_ref[t].astype(jnp.float32) + hw)   # f32 elementwise
        out_ref[t] = h.astype(out_ref.dtype)         # dense full-tile store

    # Padded tail timesteps (seq -> s_pad) also update the carry; harmless for
    # the returned per-step outputs (they are sliced off).  If a final hidden
    # state output is ever added, mask the carry update at t >= seq.
    h_scratch[...] = h


@functools.partial(
    jax.jit,
    static_argnames=("batch_first", "mxu_dtype", "out_dtype", "t_chunk",
                     "batch_tile", "single_buffer_weights"))
def elman_rnn_forward(x_in, w_ih, w_hh, b_ih, b_hh, initial_hidden=None,
                      batch_first=False, mxu_dtype=jnp.bfloat16,
                      out_dtype=None, t_chunk=None, batch_tile=None,
                      single_buffer_weights=False):
    """Elman RNN forward.

    batch_first: x_in is (batch, seq, feat) -> out (batch, seq, hidden)
    else:        x_in is (seq, batch, feat) -> out (seq, batch, hidden)
    mxu_dtype:   dtype for MXU operands (x, weights).  bf16 is the production
                 path; float32 is a (slow) validation path - f32 MXU matmuls
                 are multi-pass, especially on v5e.
    out_dtype:   output dtype (default x_in.dtype).  bf16 halves HBM writeback.
    batch_tile:  optional batch tile; otherwise the batch is auto-split across
                 detected TensorCores (v7x) via the "parallel" grid axis.
    single_buffer_weights: request pl.Buffered(1) for the grid-invariant
                 W_hh^T / h0 blocks (frees VMEM for huge hidden sizes on v7x).
    """
    if batch_first:
        batch, seq, feat = x_in.shape
    else:
        seq, batch, feat = x_in.shape
    hidden = w_ih.shape[0]
    del feat  # projection happens in the wrapper at the natural feature size

    if out_dtype is None:
        out_dtype = x_in.dtype
    out_dtype = jnp.dtype(out_dtype)
    if mxu_dtype is None:
        mxu_dtype = x_in.dtype
    mxu_dtype = jnp.dtype(mxu_dtype)
    # xw stays f32 only when explicitly validating with f32 MXU operands.
    xw_dtype = (jnp.dtype(jnp.float32) if mxu_dtype == jnp.dtype(jnp.float32)
                else jnp.dtype(jnp.bfloat16))

    # ---- Padded, tile-friendly sizes (lane x128/x256, sublane x8). ----
    h_align = 256 if hidden > 128 else 128     # 256-wide tiles for v6e/v7x MXUs
    h_pad = _round_up(hidden, h_align)
    b_pad = _round_up(batch, 8)

    cap, num_cores = _tpu_budget_and_cores()

    if batch_tile is not None:
        b_tile = _round_up(min(batch_tile, b_pad), 8)
    elif num_cores > 1 and b_pad >= 16:
        # Recurrence is independent across batch -> split across TensorCores.
        b_tile = _round_up(-(-b_pad // num_cores), 8)
    else:
        b_tile = b_pad
    b_pad = _round_up(b_pad, b_tile)
    nb = b_pad // b_tile

    # ---- VMEM budget & budget-derived time chunk. ----
    w_isz = mxu_dtype.itemsize
    xw_isz = xw_dtype.itemsize
    o_isz = out_dtype.itemsize
    n_inv = 1 if single_buffer_weights else 2            # invariant buffers
    fixed_bytes = (n_inv * (h_pad * h_pad * w_isz        # W_hh^T block(s)
                            + b_tile * h_pad * 4)        # h0 block(s), f32
                   + b_tile * h_pad * 4)                 # h carry scratch
    per_t_bytes = b_tile * h_pad * 2 * (xw_isz + o_isz)  # 2x-buffered xw + out
    budget = max(cap - (6 << 20), 8 << 20)

    if t_chunk is None:
        t_fit = (budget - fixed_bytes) // max(per_t_bytes, 1)
        t_fit = max(8, (t_fit // 8) * 8)
        t_chunk = max(8, min(64, _round_up(seq, 8), t_fit))
    else:
        t_chunk = max(8, _round_up(min(int(t_chunk), seq), 8))
    s_pad = _round_up(seq, t_chunk)
    nc = s_pad // t_chunk

    needed = per_t_bytes * t_chunk + fixed_bytes
    vmem_limit = int(min(max(needed + (4 << 20), 8 << 20), cap - (4 << 20)))

    # ---- Whole-sequence input projection (one big MXU matmul, off the serial
    #      chain).  Output is produced directly in time-major layout. ----
    f32 = jnp.float32
    bias = b_ih.astype(f32) + b_hh.astype(f32)
    x_c = x_in.astype(mxu_dtype)
    w_ih_c = w_ih.astype(mxu_dtype)
    if batch_first:
        xw = jnp.einsum("bsf,hf->sbh", x_c, w_ih_c, preferred_element_type=f32)
    else:
        xw = jnp.einsum("sbf,hf->sbh", x_c, w_ih_c, preferred_element_type=f32)
    xw = (xw + bias).astype(xw_dtype)
    xw = jnp.pad(xw, ((0, s_pad - seq), (0, b_pad - batch),
                      (0, h_pad - hidden)))

    if initial_hidden is None:
        h0 = jnp.zeros((b_pad, h_pad), dtype=f32)
    else:
        h0 = jnp.pad(initial_hidden.astype(f32),
                     ((0, b_pad - batch), (0, h_pad - hidden)))

    w_hh_t = jnp.pad(w_hh.T.astype(mxu_dtype),
                     ((0, h_pad - hidden), (0, h_pad - hidden)))

    # ---- BlockSpecs (all time-major). ----
    def _invariant_spec(shape, index_map):
        if single_buffer_weights:
            try:
                return pl.BlockSpec(shape, index_map,
                                    pipeline_mode=pl.Buffered(1))
            except Exception:
                pass   # older/stricter Pallas: fall back to default buffering
        return pl.BlockSpec(shape, index_map)

    xw_spec = pl.BlockSpec((t_chunk, b_tile, h_pad), lambda bi, c: (c, bi, 0))
    out_spec = pl.BlockSpec((t_chunk, b_tile, h_pad), lambda bi, c: (c, bi, 0))
    h0_spec = _invariant_spec((b_tile, h_pad), lambda bi, c: (bi, 0))
    whh_spec = _invariant_spec((h_pad, h_pad), lambda bi, c: (0, 0))

    kernel = functools.partial(_elman_recurrence_kernel, t_chunk=t_chunk)

    out_p = pl.pallas_call(
        kernel,
        out_shape=jax.ShapeDtypeStruct((s_pad, b_pad, h_pad), out_dtype),
        grid_spec=pltpu.PrefetchScalarGridSpec(
            num_scalar_prefetch=0,
            grid=(nb, nc),
            in_specs=[xw_spec, h0_spec, whh_spec],
            out_specs=out_spec,
            scratch_shapes=[pltpu.VMEM((b_tile, h_pad), jnp.float32)],
        ),
        compiler_params=pltpu.CompilerParams(
            # batch tiles are independent -> parallel (megacore split);
            # time chunks are a recurrence -> must stay sequential.
            dimension_semantics=("parallel", "arbitrary"),
            vmem_limit_bytes=vmem_limit,
        ),
    )(xw, h0, w_hh_t)

    out = out_p[:seq, :batch, :hidden]
    if batch_first:
        # Single XLA pass to restore (batch, seq, hidden); kept out of the
        # kernel so all in-kernel accesses stay dense time-major slabs.
        out = jnp.transpose(out, (1, 0, 2))
    return out


def init_rnn_cell_params(key, input_size, hidden_size, dtype=jnp.float32):
    """Deterministic init matching nn.RNNCell shapes: U(-1/sqrt(H), 1/sqrt(H))."""
    k1, k2, k3, k4 = jax.random.split(key, 4)
    bound = 1.0 / jnp.sqrt(jnp.array(hidden_size, dtype=jnp.float32))
    w_ih = jax.random.uniform(k1, (hidden_size, input_size), dtype,
                              minval=-bound, maxval=bound)
    w_hh = jax.random.uniform(k2, (hidden_size, hidden_size), dtype,
                              minval=-bound, maxval=bound)
    b_ih = jax.random.uniform(k3, (hidden_size,), dtype,
                              minval=-bound, maxval=bound)
    b_hh = jax.random.uniform(k4, (hidden_size,), dtype,
                              minval=-bound, maxval=bound)
    return w_ih, w_hh, b_ih, b_hh


def _reference_forward(x_in, w_ih, w_hh, b_ih, b_hh, batch_first=False):
    """Pure-JAX reference for correctness checking."""
    x = jnp.transpose(x_in, (1, 0, 2)) if batch_first else x_in
    seq, batch, _ = x.shape
    hidden = w_ih.shape[0]
    h = jnp.zeros((batch, hidden), dtype=jnp.float32)
    outs = []
    for t in range(seq):
        h = jnp.tanh(x[t].astype(jnp.float32) @ w_ih.T + b_ih
                     + h @ w_hh.T + b_hh)
        outs.append(h)
    out = jnp.stack(outs).astype(x_in.dtype)
    if batch_first:
        out = jnp.transpose(out, (1, 0, 2))
    return out


if __name__ == "__main__":
    key = jax.random.PRNGKey(0)
    k_x, k_p = jax.random.split(key)

    batch, seq, input_size, hidden_size = 2, 8, 16, 32

    x_bf = jax.random.normal(k_x, (batch, seq, input_size), dtype=jnp.float32)
    w_ih, w_hh, b_ih, b_hh = init_rnn_cell_params(k_p, input_size, hidden_size)

    # 1) batch_first layout, exact f32 MXU operands (validation path).
    out_f32 = elman_rnn_forward(x_bf, w_ih, w_hh, b_ih, b_hh,
                                batch_first=True, mxu_dtype=jnp.float32)
    out_f32 = jax.block_until_ready(out_f32)
    ref_bf = _reference_forward(x_bf, w_ih, w_hh, b_ih, b_hh, batch_first=True)
    assert out_f32.shape == (batch, seq, hidden_size), out_f32.shape
    assert jnp.allclose(out_f32, ref_bf, atol=2e-5, rtol=2e-5), \
        "f32 mismatch vs reference"

    # 2) seq-first layout, default bf16 MXU operands (production path).
    x_sf = jnp.transpose(x_bf, (1, 0, 2))
    out_bf16 = elman_rnn_forward(x_sf, w_ih, w_hh, b_ih, b_hh,
                                 batch_first=False)
    out_bf16 = jax.block_until_ready(out_bf16)
    ref_sf = _reference_forward(x_sf, w_ih, w_hh, b_ih, b_hh, batch_first=False)
    assert out_bf16.shape == (seq, batch, hidden_size), out_bf16.shape
    assert jnp.allclose(out_bf16, ref_sf, atol=3e-2, rtol=3e-2), \
        "bf16 mismatch vs reference"

    print("KERNEL_OK")
</pallas_src>

<mosaic_0001>
module attributes {stable_mosaic.version = 11 : i64} {
  func.func @_elman_recurrence_kernel(%arg0: i32, %arg1: i32, %arg2: memref<8x8x128xf32, #tpu.memory_space<vmem>>, %arg3: memref<8x128xf32, #tpu.memory_space<vmem>>, %arg4: memref<128x128xf32, #tpu.memory_space<vmem>>, %arg5: memref<8x8x128xf32, #tpu.memory_space<vmem>>, %arg6: memref<8x128xf32, #tpu.memory_space<vmem>>) attributes {dimension_semantics = [#tpu.dimension_semantics<parallel>, #tpu.dimension_semantics<arbitrary>], iteration_bounds = array<i64: 1, 1>, scalar_prefetch = 0 : i64, scratch_operands = 1 : i64, tpu.core_type = #tpu.core_type<tc>, window_params = [{transform_indices = @transform_0, window_bounds = array<i64: 8, 8, 128>}, {transform_indices = @transform_1, window_bounds = array<i64: 8, 128>}, {pipeline_mode = #tpu.pipeline_mode<synchronous>, transform_indices = @transform_2, window_bounds = array<i64: 128, 128>}, {transform_indices = @transform_3, window_bounds = array<i64: 8, 8, 128>}]} {
    %c0_i32 = arith.constant 0 : i32
    %0 = arith.cmpi eq, %arg1, %c0_i32 : i32
    %1 = arith.extui %0 : i1 to i32
    %c0_i32_0 = arith.constant 0 : i32
    %2 = arith.cmpi ne, %1, %c0_i32_0 : i32
    scf.if %2 {
      %c0_54 = arith.constant 0 : index
      %c0_55 = arith.constant 0 : index
      %70 = vector.load %arg3[%c0_54, %c0_55] : memref<8x128xf32, #tpu.memory_space<vmem>>, vector<8x128xf32>
      %c0_56 = arith.constant 0 : index
      %c0_57 = arith.constant 0 : index
      %71 = vector.load %arg6[%c0_56, %c0_57] : memref<8x128xf32, #tpu.memory_space<vmem>>, vector<8x128xf32>
      tpu.vector_store %arg6[%c0_56, %c0_57], %70 {strides = array<i32>} : memref<8x128xf32, #tpu.memory_space<vmem>>, vector<8x128xf32>,
    } else {
    }
    %c0 = arith.constant 0 : index
    %c0_1 = arith.constant 0 : index
    %3 = vector.load %arg4[%c0, %c0_1] : memref<128x128xf32, #tpu.memory_space<vmem>>, vector<128x128xf32>
    %c0_2 = arith.constant 0 : index
    %c0_3 = arith.constant 0 : index
    %4 = vector.load %arg6[%c0_2, %c0_3] : memref<8x128xf32, #tpu.memory_space<vmem>>, vector<8x128xf32>
    %cst = arith.constant dense<0.000000e+00> : vector<8x128xf32>
    %5 = tpu.matmul %4, %3, %cst {dimension_numbers = #tpu.dot_dimension_numbers<[1], [0], [0], [1], [0, 0, 1, 1], [], []>} : vector<8x128xf32>, vector<128x128xf32>, vector<8x128xf32> -> vector<8x128xf32>
    %c0_4 = arith.constant 0 : index
    %c0_5 = arith.constant 0 : index
    %c0_6 = arith.constant 0 : index
    %6 = vector.load %arg2[%c0_4, %c0_5, %c0_6] : memref<8x8x128xf32, #tpu.memory_space<vmem>>, vector<1x8x128xf32>
    %7 = vector.shape_cast %6 : vector<1x8x128xf32> to vector<8x128xf32>
    %8 = arith.addf %7, %5 : vector<8x128xf32>
    %9 = math.tanh %8 : vector<8x128xf32>
    %c0_7 = arith.constant 0 : index
    %c0_8 = arith.constant 0 : index
    %c0_9 = arith.constant 0 : index
    %10 = vector.load %arg5[%c0_7, %c0_8, %c0_9] : memref<8x8x128xf32, #tpu.memory_space<vmem>>, vector<1x8x128xf32>
    %11 = vector.shape_cast %10 : vector<1x8x128xf32> to vector<8x128xf32>
    %12 = vector.shape_cast %9 : vector<8x128xf32> to vector<1x8x128xf32>
    tpu.vector_store %arg5[%c0_7, %c0_8, %c0_9], %12 {strides = array<i32>} : memref<8x8x128xf32, #tpu.memory_space<vmem>>, vector<1x8x128xf32>,
    %cst_10 = arith.constant dense<0.000000e+00> : vector<8x128xf32>
    %13 = tpu.matmul %9, %3, %cst_10 {dimension_numbers = #tpu.dot_dimension_numbers<[1], [0], [0], [1], [0, 0, 1, 1], [], []>} : vector<8x128xf32>, vector<128x128xf32>, vector<8x128xf32> -> vector<8x128xf32>
    %c1 = arith.constant 1 : index
    %c0_11 = arith.constant 0 : index
    %c0_12 = arith.constant 0 : index
    %14 = vector.load %arg2[%c1, %c0_11, %c0_12] : memref<8x8x128xf32, #tpu.memory_space<vmem>>, vector<1x8x128xf32>
    %15 = vector.shape_cast %14 : vector<1x8x128xf32> to vector<8x128xf32>
    %16 = arith.addf %15, %13 : vector<8x128xf32>
    %17 = math.tanh %16 : vector<8x128xf32>
    %c1_13 = arith.constant 1 : index
    %c0_14 = arith.constant 0 : index
    %c0_15 = arith.constant 0 : index
    %18 = vector.load %arg5[%c1_13, %c0_14, %c0_15] : memref<8x8x128xf32, #tpu.memory_space<vmem>>, vector<1x8x128xf32>
    %19 = vector.shape_cast %18 : vector<1x8x128xf32> to vector<8x128xf32>
    %20 = vector.shape_cast %17 : vector<8x128xf32> to vector<1x8x128xf32>
    tpu.vector_store %arg5[%c1_13, %c0_14, %c0_15], %20 {strides = array<i32>} : memref<8x8x128xf32, #tpu.memory_space<vmem>>, vector<1x8x128xf32>,
    %cst_16 = arith.constant dense<0.000000e+00> : vector<8x128xf32>
    %21 = tpu.matmul %17, %3, %cst_16 {dimension_numbers = #tpu.dot_dimension_numbers<[1], [0], [0], [1], [0, 0, 1, 1], [], []>} : vector<8x128xf32>, vector<128x128xf32>, vector<8x128xf32> -> vector<8x128xf32>
    %c2 = arith.constant 2 : index
    %c0_17 = arith.constant 0 : index
    %c0_18 = arith.constant 0 : index
    %22 = vector.load %arg2[%c2, %c0_17, %c0_18] : memref<8x8x128xf32, #tpu.memory_space<vmem>>, vector<1x8x128xf32>
    %23 = vector.shape_cast %22 : vector<1x8x128xf32> to vector<8x128xf32>
    %24 = arith.addf %23, %21 : vector<8x128xf32>
    %25 = math.tanh %24 : vector<8x128xf32>
    %c2_19 = arith.constant 2 : index
    %c0_20 = arith.constant 0 : index
    %c0_21 = arith.constant 0 : index
    %26 = vector.load %arg5[%c2_19, %c0_20, %c0_21] : memref<8x8x128xf32, #tpu.memory_space<vmem>>, vector<1x8x128xf32>
    %27 = vector.shape_cast %26 : vector<1x8x128xf32> to vector<8x128xf32>
    %28 = vector.shape_cast %25 : vector<8x128xf32> to vector<1x8x128xf32>
    tpu.vector_store %arg5[%c2_19, %c0_20, %c0_21], %28 {strides = array<i32>} : memref<8x8x128xf32, #tpu.memory_space<vmem>>, vector<1x8x128xf32>,
    %cst_22 = arith.constant dense<0.000000e+00> : vector<8x128xf32>
    %29 = tpu.matmul %25, %3, %cst_22 {dimension_numbers = #tpu.dot_dimension_numbers<[1], [0], [0], [1], [0, 0, 1, 1], [], []>} : vector<8x128xf32>, vector<128x128xf32>, vector<8x128xf32> -> vector<8x128xf32>
    %c3 = arith.constant 3 : index
    %c0_23 = arith.constant 0 : index
    %c0_24 = arith.constant 0 : index
    %30 = vector.load %arg2[%c3, %c0_23, %c0_24] : memref<8x8x128xf32, #tpu.memory_space<vmem>>, vector<1x8x128xf32>
    %31 = vector.shape_cast %30 : vector<1x8x128xf32> to vector<8x128xf32>
    %32 = arith.addf %31, %29 : vector<8x128xf32>
    %33 = math.tanh %32 : vector<8x128xf32>
    %c3_25 = arith.constant 3 : index
    %c0_26 = arith.constant 0 : index
    %c0_27 = arith.constant 0 : index
    %34 = vector.load %arg5[%c3_25, %c0_26, %c0_27] : memref<8x8x128xf32, #tpu.memory_space<vmem>>, vector<1x8x128xf32>
    %35 = vector.shape_cast %34 : vector<1x8x128xf32> to vector<8x128xf32>
    %36 = vector.shape_cast %33 : vector<8x128xf32> to vector<1x8x128xf32>
    tpu.vector_store %arg5[%c3_25, %c0_26, %c0_27], %36 {strides = array<i32>} : memref<8x8x128xf32, #tpu.memory_space<vmem>>, vector<1x8x128xf32>,
    %cst_28 = arith.constant dense<0.000000e+00> : vector<8x128xf32>
    %37 = tpu.matmul %33, %3, %cst_28 {dimension_numbers = #tpu.dot_dimension_numbers<[1], [0], [0], [1], [0, 0, 1, 1], [], []>} : vector<8x128xf32>, vector<128x128xf32>, vector<8x128xf32> -> vector<8x128xf32>
    %c4 = arith.constant 4 : index
    %c0_29 = arith.constant 0 : index
    %c0_30 = arith.constant 0 : index
    %38 = vector.load %arg2[%c4, %c0_29, %c0_30] : memref<8x8x128xf32, #tpu.memory_space<vmem>>, vector<1x8x128xf32>
    %39 = vector.shape_cast %38 : vector<1x8x128xf32> to vector<8x128xf32>
    %40 = arith.addf %39, %37 : vector<8x128xf32>
    %41 = math.tanh %40 : vector<8x128xf32>
    %c4_31 = arith.constant 4 : index
    %c0_32 = arith.constant 0 : index
    %c0_33 = arith.constant 0 : index
    %42 = vector.load %arg5[%c4_31, %c0_32, %c0_33] : memref<8x8x128xf32, #tpu.memory_space<vmem>>, vector<1x8x128xf32>
    %43 = vector.shape_cast %42 : vector<1x8x128xf32> to vector<8x128xf32>
    %44 = vector.shape_cast %41 : vector<8x128xf32> to vector<1x8x128xf32>
    tpu.vector_store %arg5[%c4_31, %c0_32, %c0_33], %44 {strides = array<i32>} : memref<8x8x128xf32, #tpu.memory_space<vmem>>, vector<1x8x128xf32>,
    %cst_34 = arith.constant dense<0.000000e+00> : vector<8x128xf32>
    %45 = tpu.matmul %41, %3, %cst_34 {dimension_numbers = #tpu.dot_dimension_numbers<[1], [0], [0], [1], [0, 0, 1, 1], [], []>} : vector<8x128xf32>, vector<128x128xf32>, vector<8x128xf32> -> vector<8x128xf32>
    %c5 = arith.constant 5 : index
    %c0_35 = arith.constant 0 : index
    %c0_36 = arith.constant 0 : index
    %46 = vector.load %arg2[%c5, %c0_35, %c0_36] : memref<8x8x128xf32, #tpu.memory_space<vmem>>, vector<1x8x128xf32>
    %47 = vector.shape_cast %46 : vector<1x8x128xf32> to vector<8x128xf32>
    %48 = arith.addf %47, %45 : vector<8x128xf32>
    %49 = math.tanh %48 : vector<8x128xf32>
    %c5_37 = arith.constant 5 : index
    %c0_38 = arith.constant 0 : index
    %c0_39 = arith.constant 0 : index
    %50 = vector.load %arg5[%c5_37, %c0_38, %c0_39] : memref<8x8x128xf32, #tpu.memory_space<vmem>>, vector<1x8x128xf32>
    %51 = vector.shape_cast %50 : vector<1x8x128xf32> to vector<8x128xf32>
    %52 = vector.shape_cast %49 : vector<8x128xf32> to vector<1x8x128xf32>
    tpu.vector_store %arg5[%c5_37, %c0_38, %c0_39], %52 {strides = array<i32>} : memref<8x8x128xf32, #tpu.memory_space<vmem>>, vector<1x8x128xf32>,
    %cst_40 = arith.constant dense<0.000000e+00> : vector<8x128xf32>
    %53 = tpu.matmul %49, %3, %cst_40 {dimension_numbers = #tpu.dot_dimension_numbers<[1], [0], [0], [1], [0, 0, 1, 1], [], []>} : vector<8x128xf32>, vector<128x128xf32>, vector<8x128xf32> -> vector<8x128xf32>
    %c6 = arith.constant 6 : index
    %c0_41 = arith.constant 0 : index
    %c0_42 = arith.constant 0 : index
    %54 = vector.load %arg2[%c6, %c0_41, %c0_42] : memref<8x8x128xf32, #tpu.memory_space<vmem>>, vector<1x8x128xf32>
    %55 = vector.shape_cast %54 : vector<1x8x128xf32> to vector<8x128xf32>
    %56 = arith.addf %55, %53 : vector<8x128xf32>
    %57 = math.tanh %56 : vector<8x128xf32>
    %c6_43 = arith.constant 6 : index
    %c0_44 = arith.constant 0 : index
    %c0_45 = arith.constant 0 : index
    %58 = vector.load %arg5[%c6_43, %c0_44, %c0_45] : memref<8x8x128xf32, #tpu.memory_space<vmem>>, vector<1x8x128xf32>
    %59 = vector.shape_cast %58 : vector<1x8x128xf32> to vector<8x128xf32>
    %60 = vector.shape_cast %57 : vector<8x128xf32> to vector<1x8x128xf32>
    tpu.vector_store %arg5[%c6_43, %c0_44, %c0_45], %60 {strides = array<i32>} : memref<8x8x128xf32, #tpu.memory_space<vmem>>, vector<1x8x128xf32>,
    %cst_46 = arith.constant dense<0.000000e+00> : vector<8x128xf32>
    %61 = tpu.matmul %57, %3, %cst_46 {dimension_numbers = #tpu.dot_dimension_numbers<[1], [0], [0], [1], [0, 0, 1, 1], [], []>} : vector<8x128xf32>, vector<128x128xf32>, vector<8x128xf32> -> vector<8x128xf32>
    %c7 = arith.constant 7 : index
    %c0_47 = arith.constant 0 : index
    %c0_48 = arith.constant 0 : index
    %62 = vector.load %arg2[%c7, %c0_47, %c0_48] : memref<8x8x128xf32, #tpu.memory_space<vmem>>, vector<1x8x128xf32>
    %63 = vector.shape_cast %62 : vector<1x8x128xf32> to vector<8x128xf32>
    %64 = arith.addf %63, %61 : vector<8x128xf32>
    %65 = math.tanh %64 : vector<8x128xf32>
    %c7_49 = arith.constant 7 : index
    %c0_50 = arith.constant 0 : index
    %c0_51 = arith.constant 0 : index
    %66 = vector.load %arg5[%c7_49, %c0_50, %c0_51] : memref<8x8x128xf32, #tpu.memory_space<vmem>>, vector<1x8x128xf32>
    %67 = vector.shape_cast %66 : vector<1x8x128xf32> to vector<8x128xf32>
    %68 = vector.shape_cast %65 : vector<8x128xf32> to vector<1x8x128xf32>
    tpu.vector_store %arg5[%c7_49, %c0_50, %c0_51], %68 {strides = array<i32>} : memref<8x8x128xf32, #tpu.memory_space<vmem>>, vector<1x8x128xf32>,
    %c0_52 = arith.constant 0 : index
    %c0_53 = arith.constant 0 : index
    %69 = vector.load %arg6[%c0_52, %c0_53] : memref<8x128xf32, #tpu.memory_space<vmem>>, vector<8x128xf32>
    tpu.vector_store %arg6[%c0_52, %c0_53], %65 {strides = array<i32>} : memref<8x128xf32, #tpu.memory_space<vmem>>, vector<8x128xf32>,
    return
  }
  func.func @transform_0(%arg0: i32, %arg1: i32) -> (i32, i32, i32) {
    %c0_i32 = arith.constant 0 : i32
    %c0_i32_0 = arith.constant 0 : i32
    return %arg1, %arg0, %c0_i32 : i32, i32, i32
  }
  func.func @transform_1(%arg0: i32, %arg1: i32) -> (i32, i32) {
    %c0_i32 = arith.constant 0 : i32
    %c0_i32_0 = arith.constant 0 : i32
    return %arg0, %c0_i32 : i32, i32
  }
  func.func @transform_2(%arg0: i32, %arg1: i32) -> (i32, i32) {
    %c0_i32 = arith.constant 0 : i32
    %c0_i32_0 = arith.constant 0 : i32
    %c0_i32_1 = arith.constant 0 : i32
    return %c0_i32, %c0_i32_0 : i32, i32
  }
  func.func @transform_3(%arg0: i32, %arg1: i32) -> (i32, i32, i32) {
    %c0_i32 = arith.constant 0 : i32
    %c0_i32_0 = arith.constant 0 : i32
    return %arg1, %arg0, %c0_i32 : i32, i32, i32
  }
}

</mosaic_0001>

<bundles_post_ra>
// kernel: elman_rnn_forward.1
= control target key start
LH: loop header
LB: loop body
LE: loop exit
PB: predicated region body
PF: predicated region fallthrough
CT: control target
= control target key end

     0   :  { %v1096_v0 = vmov 0.0   ;;  %vm1097_vm0 = vmmov 0   ;;  %s1521_s2 = inlined_call_operand.vmem [shape: f32[128,128], index: 2, kind: input, shape index: {}]   ;;  %s1522_s1 = inlined_call_operand.vmem [shape: f32[8,128], index: 1, kind: input, shape index: {}]   ;;  %s1523_s0 = inlined_call_operand.vmem [shape: f32[8,8,128], index: 0, kind: input, shape index: {}]   ;;  %s1524_s3 = inlined_call_operand.vmem [shape: f32[8,8,128], index: 3, kind: output, shape index: {}]  }
   0x1   :  { %798 = vmatprep.subr.mxu0 %v1096_v0  ;;  %v1122_v1 = vld [vmem:[%s1521_s2 + $0x78] sm:$0xff]  ;;  %v1127_v2 = vld [vmem:[%s1521_s2 + $0x70] sm:$0xff]  ;;  %830 = vmatprep.mubr.msk.f32.mxu0 %vm1097_vm0, %v1096_v0  ;;  %v1137_v3 = vld [vmem:[%s1521_s2 + $0x68] sm:$0xff] }
   0x2   :  { %799 = vmatpush3.msra.mxu0 %v1122_v1  ;;  %833 = vmatprep.subr.mxu1 %v1096_v0  ;;  %v1146_v4 = vld [vmem:[%s1521_s2 + $0x60] sm:$0xff]  ;;  %v1155_v5 = vld [vmem:[%s1521_s2 + $0x58] sm:$0xff]  ;;  %v1164_v6 = vld [vmem:[%s1521_s2 + $0x50] sm:$0xff] }
   0x3   :  { %800 = vmatprep.subr.mxu0 %v1096_v0  ;;  %834 = vmatpush3.msra.mxu1 %v1122_v1  ;;  %v1173_v7 = vld [vmem:[%s1521_s2 + $0x48] sm:$0xff]  ;;  %v1182_v8 = vld [vmem:[%s1521_s2 + $0x40] sm:$0xff]  ;;  %v1191_v9 = vld [vmem:[%s1521_s2 + $0x38] sm:$0xff] }
   0x4   :  { %801 = vmatpush3.msra.mxu0 %v1127_v2  ;;  %835 = vmatprep.subr.mxu1 %v1096_v0  ;;  %v1200_v10 = vld [vmem:[%s1521_s2 + $0x30] sm:$0xff]  ;;  %v1209_v11 = vld [vmem:[%s1521_s2 + $0x28] sm:$0xff]  ;;  %v1218_v12 = vld [vmem:[%s1521_s2 + $0x20] sm:$0xff] }
   0x5   :  { %802 = vmatprep.subr.mxu0 %v1096_v0  ;;  %836 = vmatpush3.msra.mxu1 %v1127_v2  ;;  %v1227_v13 = vld [vmem:[%s1521_s2 + $0x18] sm:$0xff]  ;;  %v1236_v14 = vld [vmem:[%s1521_s2 + $0x10] sm:$0xff]  ;;  %v1245_v15 = vld [vmem:[%s1521_s2 + $0x8] sm:$0xff] }
   0x6   :  { %803 = vmatpush3.msra.mxu0 %v1137_v3  ;;  %837 = vmatprep.subr.mxu1 %v1096_v0  ;;  %v1254_v16 = vld [vmem:[%s1521_s2] sm:$0xff]  ;;  %v648_v23 = vld [vmem:[%s1523_s0 + $0x8] sm:$0xff]  ;;  %v650_v28 = vld [vmem:[%s1523_s0 + $0x10] sm:$0xff] }
   0x7   :  { %804 = vmatprep.subr.mxu0 %v1096_v0  ;;  %838 = vmatpush3.msra.mxu1 %v1137_v3  ;;  %v18_v17 = vld [vmem:[%s1522_s1] sm:$0xff]  ;;  %v652_v33 = vld [vmem:[%s1523_s0 + $0x18] sm:$0xff]  ;;  %v656_v43 = vld [vmem:[%s1523_s0 + $0x28] sm:$0xff] }
   0x8   :  { %805 = vmatpush3.msra.mxu0 %v1146_v4  ;;  %839 = vmatprep.subr.mxu1 %v1096_v0  ;;  %v107_v18 = vld [vmem:[%s1523_s0] sm:$0xff]  ;;  %v658_v48 = vld [vmem:[%s1523_s0 + $0x30] sm:$0xff]  ;;  %v660_v53 = vld [vmem:[%s1523_s0 + $0x38] sm:$0xff] }
   0x9   :  { %806 = vmatprep.subr.mxu0 %v1096_v0  ;;  %840 = vmatpush3.msra.mxu1 %v1146_v4  ;;  %v654_v38 = vld [vmem:[%s1523_s0 + $0x20] sm:$0xff] }
   0xa   :  { %807 = vmatpush3.msra.mxu0 %v1155_v5  ;;  %841 = vmatprep.subr.mxu1 %v1096_v0 }
   0xb   :  { %808 = vmatprep.subr.mxu0 %v1096_v0  ;;  %842 = vmatpush3.msra.mxu1 %v1155_v5 }
   0xc   :  { %809 = vmatpush3.msra.mxu0 %v1164_v6  ;;  %843 = vmatprep.subr.mxu1 %v1096_v0 }
   0xd   :  { %810 = vmatprep.subr.mxu0 %v1096_v0  ;;  %844 = vmatpush3.msra.mxu1 %v1164_v6 }
   0xe   :  { %811 = vmatpush3.msra.mxu0 %v1173_v7  ;;  %845 = vmatprep.subr.mxu1 %v1096_v0 }
   0xf   :  { %812 = vmatprep.subr.mxu0 %v1096_v0  ;;  %846 = vmatpush3.msra.mxu1 %v1173_v7 }
  0x10   :  { %813 = vmatpush3.msra.mxu0 %v1182_v8  ;;  %847 = vmatprep.subr.mxu1 %v1096_v0 }
  0x11   :  { %814 = vmatprep.subr.mxu0 %v1096_v0  ;;  %848 = vmatpush3.msra.mxu1 %v1182_v8 }
  0x12   :  { %815 = vmatpush3.msra.mxu0 %v1191_v9  ;;  %849 = vmatprep.subr.mxu1 %v1096_v0 }
  0x13   :  { %816 = vmatprep.subr.mxu0 %v1096_v0  ;;  %850 = vmatpush3.msra.mxu1 %v1191_v9 }
  0x14   :  { %817 = vmatpush3.msra.mxu0 %v1200_v10  ;;  %851 = vmatprep.subr.mxu1 %v1096_v0 }
  0x15   :  { %818 = vmatprep.subr.mxu0 %v1096_v0  ;;  %852 = vmatpush3.msra.mxu1 %v1200_v10 }
  0x16   :  { %819 = vmatpush3.msra.mxu0 %v1209_v11  ;;  %853 = vmatprep.subr.mxu1 %v1096_v0 }
  0x17   :  { %820 = vmatprep.subr.mxu0 %v1096_v0  ;;  %854 = vmatpush3.msra.mxu1 %v1209_v11 }
  0x18   :  { %821 = vmatpush3.msra.mxu0 %v1218_v12  ;;  %855 = vmatprep.subr.mxu1 %v1096_v0 }
  0x19   :  { %822 = vmatprep.subr.mxu0 %v1096_v0  ;;  %856 = vmatpush3.msra.mxu1 %v1218_v12 }
  0x1a   :  { %823 = vmatpush3.msra.mxu0 %v1227_v13  ;;  %857 = vmatprep.subr.mxu1 %v1096_v0 }
  0x1b   :  { %824 = vmatprep.subr.mxu0 %v1096_v0  ;;  %858 = vmatpush3.msra.mxu1 %v1227_v13 }
  0x1c   :  { %825 = vmatpush3.msra.mxu0 %v1236_v14  ;;  %859 = vmatprep.subr.mxu1 %v1096_v0 }
  0x1d   :  { %826 = vmatprep.subr.mxu0 %v1096_v0  ;;  %860 = vmatpush3.msra.mxu1 %v1236_v14 }
  0x1e   :  { %827 = vmatpush3.msra.mxu0 %v1245_v15  ;;  %861 = vmatprep.subr.mxu1 %v1096_v0 }
  0x1f   :  { %828 = vmatprep.subr.mxu0 %v1096_v0  ;;  %862 = vmatpush3.msra.mxu1 %v1245_v15 }
  0x20   :  { %829 = vmatpush3.msra.mxu0 %v1254_v16  ;;  %863 = vmatprep.subr.mxu1 %v1096_v0 }
  0x21   :  { %831 = vmatmul.mubr.f32.vlgmr.msra.gmra.mxu0 %v18_v17  ;;  %864 = vmatpush3.msra.mxu1 %v1254_v16 }
  0x22   :  { %865 = vmatprep.mubr.msk.f32.mxu1 %vm1097_vm0, %v1096_v0  ;;  %868 = vmatprep.subr.mxu0 %v1096_v0 }
  0x23   :  { %869 = vmatpush3.msra.mxu0 %v1122_v1  ;;  %900 = vmatprep.mubr.msk.f32.mxu0 %vm1097_vm0, %v1096_v0 }
  0x24   :  { %870 = vmatprep.subr.mxu0 %v1096_v0  ;;  %903 = vmatprep.subr.mxu1 %v1096_v0 }
  0x25   :  { %871 = vmatpush3.msra.mxu0 %v1127_v2 }
  0x26   :  { %872 = vmatprep.subr.mxu0 %v1096_v0 }
  0x27   :  { %873 = vmatpush3.msra.mxu0 %v1137_v3 }
  0x28   :  { %874 = vmatprep.subr.mxu0 %v1096_v0 }
  0x29   :  { %875 = vmatpush3.msra.mxu0 %v1146_v4 }
  0x2a   :  { %876 = vmatprep.subr.mxu0 %v1096_v0 }
  0x2b   :  { %877 = vmatpush3.msra.mxu0 %v1155_v5 }
  0x2c   :  { %878 = vmatprep.subr.mxu0 %v1096_v0 }
  0x2d   :  { %879 = vmatpush3.msra.mxu0 %v1164_v6 }
  0x2e   :  { %880 = vmatprep.subr.mxu0 %v1096_v0 }
  0x2f   :  { %881 = vmatpush3.msra.mxu0 %v1173_v7 }
  0x30   :  { %882 = vmatprep.subr.mxu0 %v1096_v0 }
  0x31   :  { %883 = vmatpush3.msra.mxu0 %v1182_v8 }
  0x32   :  { %884 = vmatprep.subr.mxu0 %v1096_v0 }
  0x33   :  { %885 = vmatpush3.msra.mxu0 %v1191_v9 }
  0x34   :  { %886 = vmatprep.subr.mxu0 %v1096_v0 }
  0x35   :  { %887 = vmatpush3.msra.mxu0 %v1200_v10 }
  0x36   :  { %888 = vmatprep.subr.mxu0 %v1096_v0 }
  0x37   :  { %889 = vmatpush3.msra.mxu0 %v1209_v11 }
  0x38   :  { %890 = vmatprep.subr.mxu0 %v1096_v0 }
  0x39   :  { %891 = vmatpush3.msra.mxu0 %v1218_v12 }
  0x3a   :  { %892 = vmatprep.subr.mxu0 %v1096_v0 }
  0x3b   :  { %893 = vmatpush3.msra.mxu0 %v1227_v13 }
  0x3c   :  { %894 = vmatprep.subr.mxu0 %v1096_v0 }
  0x3d   :  { %895 = vmatpush3.msra.mxu0 %v1236_v14 }
  0x3e   :  { %896 = vmatprep.subr.mxu0 %v1096_v0 }
  0x3f   :  { %897 = vmatpush3.msra.mxu0 %v1245_v15 }
  0x40   :  { %898 = vmatprep.subr.mxu0 %v1096_v0 }
  0x41   :  { %899 = vmatpush3.msra.mxu0 %v1254_v16 }
  0x42   :  { %938 = vmatprep.subr.mxu0 %v1096_v0 }
  0xe1   :  { %v103_v19 = vpop.f32.mrf.mxu0 }
  0xe2   :  { %v108_v20 = vadd.f32 %v107_v18, %v103_v19 }
  0xe3   :  { %v832_v21 = vpop.f32.mrf.mxu0 }
  0xe4   :  { %1080 = vtanh.f32 %v108_v20 }
  0xf1   :  { %v1081_v22 = vpop.eup %1080 }
  0xf2   :  { %110 = vst [vmem:[%s1524_s3] sm:$0xff] %v1081_v22  ;;  %866 = vmatmul.mubr.f32.vlgmr.msra.gmra.mxu1 %v1081_v22 }
  0xf3   :  { %904 = vmatpush3.msra.mxu1 %v1122_v1  ;;  %935 = vmatprep.mubr.msk.f32.mxu1 %vm1097_vm0, %v1096_v0 }
  0xf4   :  { %905 = vmatprep.subr.mxu1 %v1096_v0 }
  0xf5   :  { %906 = vmatpush3.msra.mxu1 %v1127_v2 }
  0xf6   :  { %907 = vmatprep.subr.mxu1 %v1096_v0 }
  0xf7   :  { %908 = vmatpush3.msra.mxu1 %v1137_v3 }
  0xf8   :  { %909 = vmatprep.subr.mxu1 %v1096_v0 }
  0xf9   :  { %910 = vmatpush3.msra.mxu1 %v1146_v4 }
  0xfa   :  { %911 = vmatprep.subr.mxu1 %v1096_v0 }
  0xfb   :  { %912 = vmatpush3.msra.mxu1 %v1155_v5 }
  0xfc   :  { %913 = vmatprep.subr.mxu1 %v1096_v0 }
  0xfd   :  { %914 = vmatpush3.msra.mxu1 %v1164_v6 }
  0xfe   :  { %915 = vmatprep.subr.mxu1 %v1096_v0 }
  0xff   :  { %916 = vmatpush3.msra.mxu1 %v1173_v7 }
 0x100   :  { %917 = vmatprep.subr.mxu1 %v1096_v0 }
 0x101   :  { %918 = vmatpush3.msra.mxu1 %v1182_v8 }
 0x102   :  { %919 = vmatprep.subr.mxu1 %v1096_v0 }
 0x103   :  { %920 = vmatpush3.msra.mxu1 %v1191_v9 }
 0x104   :  { %921 = vmatprep.subr.mxu1 %v1096_v0 }
 0x105   :  { %922 = vmatpush3.msra.mxu1 %v1200_v10 }
 0x106   :  { %923 = vmatprep.subr.mxu1 %v1096_v0 }
 0x107   :  { %924 = vmatpush3.msra.mxu1 %v1209_v11 }
 0x108   :  { %925 = vmatprep.subr.mxu1 %v1096_v0 }
 0x109   :  { %926 = vmatpush3.msra.mxu1 %v1218_v12 }
 0x10a   :  { %927 = vmatprep.subr.mxu1 %v1096_v0 }
 0x10b   :  { %928 = vmatpush3.msra.mxu1 %v1227_v13 }
 0x10c   :  { %929 = vmatprep.subr.mxu1 %v1096_v0 }
 0x10d   :  { %930 = vmatpush3.msra.mxu1 %v1236_v14 }
 0x10e   :  { %931 = vmatprep.subr.mxu1 %v1096_v0 }
 0x10f   :  { %932 = vmatpush3.msra.mxu1 %v1245_v15 }
 0x110   :  { %933 = vmatprep.subr.mxu1 %v1096_v0 }
 0x111   :  { %934 = vmatpush3.msra.mxu1 %v1254_v16 }
 0x112   :  { %973 = vmatprep.subr.mxu1 %v1096_v0 }
 0x1b2   :  { %v177_v24 = vpop.f32.mrf.mxu1 }
 0x1b3   :  { %v183_v25 = vadd.f32 %v648_v23, %v177_v24 }
 0x1b4   :  { %v867_v26 = vpop.f32.mrf.mxu1 }
 0x1b5   :  { %1082 = vtanh.f32 %v183_v25 }
 0x1c2   :  { %v1083_v27 = vpop.eup %1082 }
 0x1c3   :  { %649 = vst [vmem:[%s1524_s3 + $0x8] sm:$0xff] %v1083_v27  ;;  %901 = vmatmul.mubr.f32.vlgmr.msra.gmra.mxu0 %v1083_v27 }
 0x1c4   :  { %939 = vmatpush3.msra.mxu0 %v1122_v1  ;;  %970 = vmatprep.mubr.msk.f32.mxu0 %vm1097_vm0, %v1096_v0 }
 0x1c5   :  { %940 = vmatprep.subr.mxu0 %v1096_v0 }
 0x1c6   :  { %941 = vmatpush3.msra.mxu0 %v1127_v2 }
 0x1c7   :  { %942 = vmatprep.subr.mxu0 %v1096_v0 }
 0x1c8   :  { %943 = vmatpush3.msra.mxu0 %v1137_v3 }
 0x1c9   :  { %944 = vmatprep.subr.mxu0 %v1096_v0 }
 0x1ca   :  { %945 = vmatpush3.msra.mxu0 %v1146_v4 }
 0x1cb   :  { %946 = vmatprep.subr.mxu0 %v1096_v0 }
 0x1cc   :  { %947 = vmatpush3.msra.mxu0 %v1155_v5 }
 0x1cd   :  { %948 = vmatprep.subr.mxu0 %v1096_v0 }
 0x1ce   :  { %949 = vmatpush3.msra.mxu0 %v1164_v6 }
 0x1cf   :  { %950 = vmatprep.subr.mxu0 %v1096_v0 }
 0x1d0   :  { %951 = vmatpush3.msra.mxu0 %v1173_v7 }
 0x1d1   :  { %952 = vmatprep.subr.mxu0 %v1096_v0 }
 0x1d2   :  { %953 = vmatpush3.msra.mxu0 %v1182_v8 }
 0x1d3   :  { %954 = vmatprep.subr.mxu0 %v1096_v0 }
 0x1d4   :  { %955 = vmatpush3.msra.mxu0 %v1191_v9 }
 0x1d5   :  { %956 = vmatprep.subr.mxu0 %v1096_v0 }
 0x1d6   :  { %957 = vmatpush3.msra.mxu0 %v1200_v10 }
 0x1d7   :  { %958 = vmatprep.subr.mxu0 %v1096_v0 }
 0x1d8   :  { %959 = vmatpush3.msra.mxu0 %v1209_v11 }
 0x1d9   :  { %960 = vmatprep.subr.mxu0 %v1096_v0 }
 0x1da   :  { %961 = vmatpush3.msra.mxu0 %v1218_v12 }
 0x1db   :  { %962 = vmatprep.subr.mxu0 %v1096_v0 }
 0x1dc   :  { %963 = vmatpush3.msra.mxu0 %v1227_v13 }
 0x1dd   :  { %964 = vmatprep.subr.mxu0 %v1096_v0 }
 0x1de   :  { %965 = vmatpush3.msra.mxu0 %v1236_v14 }
 0x1df   :  { %966 = vmatprep.subr.mxu0 %v1096_v0 }
 0x1e0   :  { %967 = vmatpush3.msra.mxu0 %v1245_v15 }
 0x1e1   :  { %968 = vmatprep.subr.mxu0 %v1096_v0 }
 0x1e2   :  { %969 = vmatpush3.msra.mxu0 %v1254_v16 }
 0x1e3   :  { %1008 = vmatprep.subr.mxu0 %v1096_v0 }
 0x283   :  { %v253_v29 = vpop.f32.mrf.mxu0 }
 0x284   :  { %v259_v30 = vadd.f32 %v650_v28, %v253_v29 }
 0x285   :  { %v902_v31 = vpop.f32.mrf.mxu0 }
 0x286   :  { %1084 = vtanh.f32 %v259_v30 }
 0x293   :  { %v1085_v32 = vpop.eup %1084 }
 0x294   :  { %651 = vst [vmem:[%s1524_s3 + $0x10] sm:$0xff] %v1085_v32  ;;  %936 = vmatmul.mubr.f32.vlgmr.msra.gmra.mxu1 %v1085_v32 }
 0x295   :  { %974 = vmatpush3.msra.mxu1 %v1122_v1  ;;  %1005 = vmatprep.mubr.msk.f32.mxu1 %vm1097_vm0, %v1096_v0 }
 0x296   :  { %975 = vmatprep.subr.mxu1 %v1096_v0 }
 0x297   :  { %976 = vmatpush3.msra.mxu1 %v1127_v2 }
 0x298   :  { %977 = vmatprep.subr.mxu1 %v1096_v0 }
 0x299   :  { %978 = vmatpush3.msra.mxu1 %v1137_v3 }
 0x29a   :  { %979 = vmatprep.subr.mxu1 %v1096_v0 }
 0x29b   :  { %980 = vmatpush3.msra.mxu1 %v1146_v4 }
 0x29c   :  { %981 = vmatprep.subr.mxu1 %v1096_v0 }
 0x29d   :  { %982 = vmatpush3.msra.mxu1 %v1155_v5 }
 0x29e   :  { %983 = vmatprep.subr.mxu1 %v1096_v0 }
 0x29f   :  { %984 = vmatpush3.msra.mxu1 %v1164_v6 }
 0x2a0   :  { %985 = vmatprep.subr.mxu1 %v1096_v0 }
 0x2a1   :  { %986 = vmatpush3.msra.mxu1 %v1173_v7 }
 0x2a2   :  { %987 = vmatprep.subr.mxu1 %v1096_v0 }
 0x2a3   :  { %988 = vmatpush3.msra.mxu1 %v1182_v8 }
 0x2a4   :  { %989 = vmatprep.subr.mxu1 %v1096_v0 }
 0x2a5   :  { %990 = vmatpush3.msra.mxu1 %v1191_v9 }
 0x2a6   :  { %991 = vmatprep.subr.mxu1 %v1096_v0 }
 0x2a7   :  { %992 = vmatpush3.msra.mxu1 %v1200_v10 }
 0x2a8   :  { %993 = vmatprep.subr.mxu1 %v1096_v0 }
 0x2a9   :  { %994 = vmatpush3.msra.mxu1 %v1209_v11 }
 0x2aa   :  { %995 = vmatprep.subr.mxu1 %v1096_v0 }
 0x2ab   :  { %996 = vmatpush3.msra.mxu1 %v1218_v12 }
 0x2ac   :  { %997 = vmatprep.subr.mxu1 %v1096_v0 }
 0x2ad   :  { %998 = vmatpush3.msra.mxu1 %v1227_v13 }
 0x2ae   :  { %999 = vmatprep.subr.mxu1 %v1096_v0 }
 0x2af   :  { %1000 = vmatpush3.msra.mxu1 %v1236_v14 }
 0x2b0   :  { %1001 = vmatprep.subr.mxu1 %v1096_v0 }
 0x2b1   :  { %1002 = vmatpush3.msra.mxu1 %v1245_v15 }
 0x2b2   :  { %1003 = vmatprep.subr.mxu1 %v1096_v0 }
 0x2b3   :  { %1004 = vmatpush3.msra.mxu1 %v1254_v16 }
 0x2b4   :  { %1043 = vmatprep.subr.mxu1 %v1096_v0 }
 0x354   :  { %v329_v34 = vpop.f32.mrf.mxu1 }
 0x355   :  { %v335_v35 = vadd.f32 %v652_v33, %v329_v34 }
 0x356   :  { %v937_v36 = vpop.f32.mrf.mxu1 }
 0x357   :  { %1086 = vtanh.f32 %v335_v35 }
 0x364   :  { %v1087_v37 = vpop.eup %1086 }
 0x365   :  { %653 = vst [vmem:[%s1524_s3 + $0x18] sm:$0xff] %v1087_v37  ;;  %971 = vmatmul.mubr.f32.vlgmr.msra.gmra.mxu0 %v1087_v37 }
 0x366   :  { %1009 = vmatpush3.msra.mxu0 %v1122_v1  ;;  %1040 = vmatprep.mubr.msk.f32.mxu0 %vm1097_vm0, %v1096_v0 }
 0x367   :  { %1010 = vmatprep.subr.mxu0 %v1096_v0 }
 0x368   :  { %1011 = vmatpush3.msra.mxu0 %v1127_v2 }
 0x369   :  { %1012 = vmatprep.subr.mxu0 %v1096_v0 }
 0x36a   :  { %1013 = vmatpush3.msra.mxu0 %v1137_v3 }
 0x36b   :  { %1014 = vmatprep.subr.mxu0 %v1096_v0 }
 0x36c   :  { %1015 = vmatpush3.msra.mxu0 %v1146_v4 }
 0x36d   :  { %1016 = vmatprep.subr.mxu0 %v1096_v0 }
 0x36e   :  { %1017 = vmatpush3.msra.mxu0 %v1155_v5 }
 0x36f   :  { %1018 = vmatprep.subr.mxu0 %v1096_v0 }
 0x370   :  { %1019 = vmatpush3.msra.mxu0 %v1164_v6 }
 0x371   :  { %1020 = vmatprep.subr.mxu0 %v1096_v0 }
 0x372   :  { %1021 = vmatpush3.msra.mxu0 %v1173_v7 }
 0x373   :  { %1022 = vmatprep.subr.mxu0 %v1096_v0 }
 0x374   :  { %1023 = vmatpush3.msra.mxu0 %v1182_v8 }
 0x375   :  { %1024 = vmatprep.subr.mxu0 %v1096_v0 }
 0x376   :  { %1025 = vmatpush3.msra.mxu0 %v1191_v9 }
 0x377   :  { %1026 = vmatprep.subr.mxu0 %v1096_v0 }
 0x378   :  { %1027 = vmatpush3.msra.mxu0 %v1200_v10 }
 0x379   :  { %1028 = vmatprep.subr.mxu0 %v1096_v0 }
 0x37a   :  { %1029 = vmatpush3.msra.mxu0 %v1209_v11 }
 0x37b   :  { %1030 = vmatprep.subr.mxu0 %v1096_v0 }
 0x37c   :  { %1031 = vmatpush3.msra.mxu0 %v1218_v12 }
 0x37d   :  { %1032 = vmatprep.subr.mxu0 %v1096_v0 }
 0x37e   :  { %1033 = vmatpush3.msra.mxu0 %v1227_v13 }
 0x37f   :  { %1034 = vmatprep.subr.mxu0 %v1096_v0 }
 0x380   :  { %1035 = vmatpush3.msra.mxu0 %v1236_v14 }
 0x381   :  { %1036 = vmatprep.subr.mxu0 %v1096_v0 }
 0x382   :  { %1037 = vmatpush3.msra.mxu0 %v1245_v15 }
 0x383   :  { %1038 = vmatprep.subr.mxu0 %v1096_v0 }
 0x384   :  { %1039 = vmatpush3.msra.mxu0 %v1254_v16 }
 0x425   :  { %v405_v39 = vpop.f32.mrf.mxu0 }
 0x426   :  { %v411_v40 = vadd.f32 %v654_v38, %v405_v39 }
 0x427   :  { %v972_v41 = vpop.f32.mrf.mxu0 }
 0x428   :  { %1088 = vtanh.f32 %v411_v40 }
 0x435   :  { %v1089_v42 = vpop.eup %1088 }
 0x436   :  { %655 = vst [vmem:[%s1524_s3 + $0x20] sm:$0xff] %v1089_v42  ;;  %1006 = vmatmul.mubr.f32.vlgmr.msra.gmra.mxu1 %v1089_v42 }
 0x437   :  { %1044 = vmatpush3.msra.mxu1 %v1122_v1  ;;  %1075 = vmatprep.mubr.msk.f32.mxu1 %vm1097_vm0, %v1096_v0 }
 0x438   :  { %1045 = vmatprep.subr.mxu1 %v1096_v0 }
 0x439   :  { %1046 = vmatpush3.msra.mxu1 %v1127_v2 }
 0x43a   :  { %1047 = vmatprep.subr.mxu1 %v1096_v0 }
 0x43b   :  { %1048 = vmatpush3.msra.mxu1 %v1137_v3 }
 0x43c   :  { %1049 = vmatprep.subr.mxu1 %v1096_v0 }
 0x43d   :  { %1050 = vmatpush3.msra.mxu1 %v1146_v4 }
 0x43e   :  { %1051 = vmatprep.subr.mxu1 %v1096_v0 }
 0x43f   :  { %1052 = vmatpush3.msra.mxu1 %v1155_v5 }
 0x440   :  { %1053 = vmatprep.subr.mxu1 %v1096_v0 }
 0x441   :  { %1054 = vmatpush3.msra.mxu1 %v1164_v6 }
 0x442   :  { %1055 = vmatprep.subr.mxu1 %v1096_v0 }
 0x443   :  { %1056 = vmatpush3.msra.mxu1 %v1173_v7 }
 0x444   :  { %1057 = vmatprep.subr.mxu1 %v1096_v0 }
 0x445   :  { %1058 = vmatpush3.msra.mxu1 %v1182_v8 }
 0x446   :  { %1059 = vmatprep.subr.mxu1 %v1096_v0 }
 0x447   :  { %1060 = vmatpush3.msra.mxu1 %v1191_v9 }
 0x448   :  { %1061 = vmatprep.subr.mxu1 %v1096_v0 }
 0x449   :  { %1062 = vmatpush3.msra.mxu1 %v1200_v10 }
 0x44a   :  { %1063 = vmatprep.subr.mxu1 %v1096_v0 }
 0x44b   :  { %1064 = vmatpush3.msra.mxu1 %v1209_v11 }
 0x44c   :  { %1065 = vmatprep.subr.mxu1 %v1096_v0 }
 0x44d   :  { %1066 = vmatpush3.msra.mxu1 %v1218_v12 }
 0x44e   :  { %1067 = vmatprep.subr.mxu1 %v1096_v0 }
 0x44f   :  { %1068 = vmatpush3.msra.mxu1 %v1227_v13 }
 0x450   :  { %1069 = vmatprep.subr.mxu1 %v1096_v0 }
 0x451   :  { %1070 = vmatpush3.msra.mxu1 %v1236_v14 }
 0x452   :  { %1071 = vmatprep.subr.mxu1 %v1096_v0 }
 0x453   :  { %1072 = vmatpush3.msra.mxu1 %v1245_v15 }
 0x454   :  { %1073 = vmatprep.subr.mxu1 %v1096_v0 }
 0x455   :  { %1074 = vmatpush3.msra.mxu1 %v1254_v16 }
 0x4f6   :  { %v481_v44 = vpop.f32.mrf.mxu1 }
 0x4f7   :  { %v487_v45 = vadd.f32 %v656_v43, %v481_v44 }
 0x4f8   :  { %v1007_v46 = vpop.f32.mrf.mxu1 }
 0x4f9   :  { %1090 = vtanh.f32 %v487_v45 }
 0x506   :  { %v1091_v47 = vpop.eup %1090 }
 0x507   :  { %657 = vst [vmem:[%s1524_s3 + $0x28] sm:$0xff] %v1091_v47  ;;  %1041 = vmatmul.mubr.f32.vlgmr.msra.gmra.mxu0 %v1091_v47 }
 0x5c7   :  { %v557_v49 = vpop.f32.mrf.mxu0 }
 0x5c8   :  { %v563_v50 = vadd.f32 %v658_v48, %v557_v49 }
 0x5c9   :  { %v1042_v51 = vpop.f32.mrf.mxu0 }
 0x5ca   :  { %1092 = vtanh.f32 %v563_v50 }
 0x5d7   :  { %v1093_v52 = vpop.eup %1092 }
 0x5d8   :  { %659 = vst [vmem:[%s1524_s3 + $0x30] sm:$0xff] %v1093_v52  ;;  %1076 = vmatmul.mubr.f32.vlgmr.msra.gmra.mxu1 %v1093_v52 }
 0x698   :  { %v633_v54 = vpop.f32.mrf.mxu1 }
 0x699   :  { %v639_v55 = vadd.f32 %v660_v53, %v633_v54 }
 0x69a   :  { %v1077_v56 = vpop.f32.mrf.mxu1 }
 0x69b   :  { %1094 = vtanh.f32 %v639_v55 }
 0x6a8   :  { %v1095_v57 = vpop.eup %1094 }
 0x6a9   :  { %661 = vst [vmem:[%s1524_s3 + $0x38] sm:$0xff] %v1095_v57 }

</bundles_post_ra>
